<compile_context>
chip_gen: v5e
topology: v5e:2x2
jax: 0.10.0
libtpu: 0.0.40
codegen_flags: <defaults>
</compile_context>

<pallas_src>
import functools
import math

import jax
import jax.numpy as jnp
import numpy as np
from jax.experimental import pallas as pl
from jax.experimental.pallas import tpu as pltpu

LOG_2PI = float(np.log(2.0 * np.pi))


def _round_up(x, m):
    return ((x + m - 1) // m) * m


def _ppo_tile_kernel(state_ref, side_ref, w1_ref, b1_ref, w2_ref, b2_ref,
                     part_ref, *, action_var, eps_clip, action_dim):
    A = action_dim

    # ---- fused actor|critic layer 1: one MXU pass over the shared LHS tile ----
    h = jnp.dot(state_ref[...], w1_ref[...],
                preferred_element_type=jnp.float32) + b1_ref[...]        # [T, 2H] f32
    h = jnp.maximum(h, 0.0)

    # ---- fused (block-diagonal) layer 2: cols [:A] = actor mean, [A] = value ----
    out2 = jnp.dot(h.astype(w2_ref.dtype), w2_ref[...],
                   preferred_element_type=jnp.float32) + b2_ref[...]     # [T, A+1] f32
    mu = out2[:, :A]                                                     # [T, A]
    v = out2[:, A:A + 1]                                                 # [T, 1]

    # ---- packed per-sample side inputs: [actions | old_logprob | reward | adv | mask]
    side = side_ref[...]                                                 # [T, A+4] f32
    act = side[:, :A]
    oldlp = side[:, A:A + 1]
    rew = side[:, A + 1:A + 2]
    adv = side[:, A + 2:A + 3]
    mask = side[:, A + 3:A + 4]

    # ---- MultivariateNormal(mu, var*I) log_prob ----
    diff = act - mu
    maha = jnp.sum(diff * diff, axis=-1, keepdims=True) * (1.0 / action_var)
    logprob = -0.5 * (maha + A * (LOG_2PI + math.log(action_var)))       # [T, 1]

    # ---- PPO clipped surrogate + value MSE (per-row, masked) ----
    ratios = jnp.exp(logprob - oldlp)
    surr1 = ratios * adv
    surr2 = jnp.clip(ratios, 1.0 - eps_clip, 1.0 + eps_clip) * adv
    per_row = -jnp.minimum(surr1, surr2) + 0.5 * (v - rew) ** 2          # [T, 1]
    partial = jnp.sum(mask * per_row)                                    # tile scalar

    # Lane-dense per-tile partial (one unmasked vst row); summed outside the kernel.
    part_ref[...] = jnp.full(part_ref.shape, partial, dtype=part_ref.dtype)


def _pack_weights(params, A, matmul_dtype):
    H = params["aw1"].shape[1]
    w1 = jnp.concatenate([params["aw1"], params["cw1"]], axis=1).astype(matmul_dtype)
    b1 = jnp.concatenate([params["ab1"], params["cb1"]], axis=1).astype(jnp.float32)
    w2 = jnp.zeros((2 * H, A + 1), jnp.float32)
    w2 = w2.at[:H, :A].set(params["aw2"]).at[H:, A:].set(params["cw2"])
    w2 = w2.astype(matmul_dtype)
    b2 = jnp.concatenate([params["ab2"], params["cb2"]], axis=1).astype(jnp.float32)
    return w1, b1, w2, b2


def ppo_loss(state, params, old_actions, old_logprobs, rewards, advantages,
             *, action_std, eps_clip, tile_b=None, matmul_dtype=jnp.bfloat16):
    B, F = state.shape
    A = old_actions.shape[1]
    var = float(action_std) * float(action_std)

    if tile_b is None:
        # real PPO minibatches: big MXU-friendly tiles; sized to fit v7x's VMEM too.
        tile_b = min(1024, _round_up(B, 8))
    tile_b = max(8, _round_up(int(tile_b), 8))
    padded_B = _round_up(B, tile_b)
    G = padded_B // tile_b

    w1, b1, w2, b2 = _pack_weights(params, A, matmul_dtype)
    H2 = w1.shape[1]

    # Pad batch to a whole number of tiles; mask column kills padded rows.
    state_p = jnp.pad(state.astype(jnp.float32),
                      ((0, padded_B - B), (0, 0))).astype(matmul_dtype)
    side = jnp.concatenate(
        [old_actions.astype(jnp.float32),
         old_logprobs.reshape(B, 1).astype(jnp.float32),
         rewards.reshape(B, 1).astype(jnp.float32),
         advantages.reshape(B, 1).astype(jnp.float32),
         jnp.ones((B, 1), jnp.float32)], axis=1)                         # [B, A+4]
    side_p = jnp.pad(side, ((0, padded_B - B), (0, 0)))

    kernel = functools.partial(_ppo_tile_kernel, action_var=var,
                               eps_clip=float(eps_clip), action_dim=A)

    grid_spec = pltpu.PrefetchScalarGridSpec(
        num_scalar_prefetch=0,
        grid=(G,),
        in_specs=[
            pl.BlockSpec((tile_b, F), lambda i: (i, 0)),          # state tile
            pl.BlockSpec((tile_b, A + 4), lambda i: (i, 0)),      # packed side tile
            pl.BlockSpec((F, H2), lambda i: (0, 0)),              # fused W1 (resident)
            pl.BlockSpec((1, H2), lambda i: (0, 0)),              # fused b1
            pl.BlockSpec((H2, A + 1), lambda i: (0, 0)),          # block-diag W2
            pl.BlockSpec((1, A + 1), lambda i: (0, 0)),           # fused b2
        ],
        out_specs=pl.BlockSpec((1, 1, 128), lambda i: (i, 0, 0)),
    )

    itemsize = jnp.dtype(matmul_dtype).itemsize
    flops = 2 * padded_B * F * H2 + 2 * padded_B * H2 * (A + 1)
    bytes_accessed = (state_p.size * itemsize + side_p.size * 4
                      + w1.size * itemsize + b1.size * 4
                      + w2.size * itemsize + b2.size * 4 + G * 128 * 4)

    partials = pl.pallas_call(
        kernel,
        grid_spec=grid_spec,
        out_shape=jax.ShapeDtypeStruct((G, 1, 128), jnp.float32),
        compiler_params=pltpu.CompilerParams(
            dimension_semantics=("parallel",)),
        cost_estimate=pl.CostEstimate(
            flops=int(flops), transcendentals=int(padded_B),
            bytes_accessed=int(bytes_accessed)),
    )(state_p, side_p, w1, b1, w2, b2)

    entropy = 0.5 * A * (1.0 + LOG_2PI) + 0.5 * A * math.log(var)  # constant per sample
    return jnp.sum(partials[:, 0, 0]) / B - 0.01 * entropy


# ---------------------------------------------------------------------------
# Parameter init (PyTorch default Linear init) and pure-JAX reference.
# ---------------------------------------------------------------------------
def _init_linear(key, fan_in, fan_out):
    kw, kb = jax.random.split(key)
    bound = 1.0 / math.sqrt(fan_in)
    w = jax.random.uniform(kw, (fan_in, fan_out), jnp.float32, -bound, bound)
    b = jax.random.uniform(kb, (1, fan_out), jnp.float32, -bound, bound)
    return w, b


def init_params(key, feat_dim, hidden, action_dim):
    k1, k2, k3, k4 = jax.random.split(key, 4)
    aw1, ab1 = _init_linear(k1, feat_dim, hidden)
    aw2, ab2 = _init_linear(k2, hidden, action_dim)
    cw1, cb1 = _init_linear(k3, feat_dim, hidden)
    cw2, cb2 = _init_linear(k4, hidden, 1)
    return dict(aw1=aw1, ab1=ab1, aw2=aw2, ab2=ab2,
                cw1=cw1, cb1=cb1, cw2=cw2, cb2=cb2)


def ppo_loss_ref(state, params, old_actions, old_logprobs, rewards, advantages,
                 *, action_std, eps_clip, matmul_dtype=jnp.bfloat16):
    # Pure-JAX reference mirroring the PyTorch math (same bf16 MXU operand casts).
    A = old_actions.shape[1]
    var = float(action_std) * float(action_std)
    w1, b1, w2, b2 = _pack_weights(params, A, matmul_dtype)
    x = state.astype(matmul_dtype)
    h = jnp.maximum(jnp.dot(x, w1, preferred_element_type=jnp.float32) + b1, 0.0)
    out2 = jnp.dot(h.astype(matmul_dtype), w2,
                   preferred_element_type=jnp.float32) + b2
    mu = out2[:, :A]
    v = out2[:, A]
    maha = jnp.sum((old_actions - mu) ** 2, axis=-1) / var
    logp = -0.5 * (maha + A * (LOG_2PI + math.log(var)))
    ent = 0.5 * A * (1.0 + LOG_2PI) + 0.5 * A * math.log(var)
    ratios = jnp.exp(logp - old_logprobs)
    surr1 = ratios * advantages
    surr2 = jnp.clip(ratios, 1.0 - eps_clip, 1.0 + eps_clip) * advantages
    mse = jnp.mean((v - rewards) ** 2)
    return jnp.mean(-jnp.minimum(surr1, surr2) + 0.5 * mse - 0.01 * ent)


if __name__ == "__main__":
    B, FEAT, HIDDEN, ACTION = 20, 32, 512, 4      # hidden_size=512 per the module
    ACTION_STD, EPS_CLIP = 0.6, 0.2
    TILE_B = 16                                   # -> 2 grid tiles + ragged tail (masked)

    key = jax.random.PRNGKey(0)
    kp, ks, ka, kl, kr, kadv = jax.random.split(key, 6)
    params = init_params(kp, FEAT, HIDDEN, ACTION)

    state = jax.random.normal(ks, (B, FEAT), jnp.float32)
    old_actions = jax.random.normal(ka, (B, ACTION), jnp.float32)
    old_logprobs = jax.random.normal(kl, (B,), jnp.float32)
    rewards = jax.random.normal(kr, (B,), jnp.float32)
    advantages = jax.random.normal(kadv, (B,), jnp.float32)

    loss = ppo_loss(state, params, old_actions, old_logprobs, rewards, advantages,
                    action_std=ACTION_STD, eps_clip=EPS_CLIP, tile_b=TILE_B)
    loss = jax.block_until_ready(loss)

    ref = ppo_loss_ref(state, params, old_actions, old_logprobs, rewards, advantages,
                       action_std=ACTION_STD, eps_clip=EPS_CLIP)
    np.testing.assert_allclose(np.asarray(loss), np.asarray(ref),
                               rtol=2e-3, atol=2e-4)

    print("KERNEL_OK")
</pallas_src>

<mosaic_0001>
module attributes {stable_mosaic.version = 11 : i64} {
  func.func @_ppo_tile_kernel(%arg0: i32, %arg1: memref<16x32xbf16, #tpu.memory_space<vmem>>, %arg2: memref<16x8xf32, #tpu.memory_space<vmem>>, %arg3: memref<32x1024xbf16, #tpu.memory_space<vmem>>, %arg4: memref<1x1024xf32, #tpu.memory_space<vmem>>, %arg5: memref<1024x5xbf16, #tpu.memory_space<vmem>>, %arg6: memref<1x5xf32, #tpu.memory_space<vmem>>, %arg7: memref<1x1x128xf32, #tpu.memory_space<vmem>>) attributes {dimension_semantics = [#tpu.dimension_semantics<parallel>], iteration_bounds = array<i64: 2>, scalar_prefetch = 0 : i64, scratch_operands = 0 : i64, tpu.core_type = #tpu.core_type<tc>, window_params = [{transform_indices = @transform_0, window_bounds = array<i64: 16, 32>}, {transform_indices = @transform_1, window_bounds = array<i64: 16, 8>}, {pipeline_mode = #tpu.pipeline_mode<synchronous>, transform_indices = @transform_2, window_bounds = array<i64: 32, 1024>}, {pipeline_mode = #tpu.pipeline_mode<synchronous>, transform_indices = @transform_3, window_bounds = array<i64: 1, 1024>}, {pipeline_mode = #tpu.pipeline_mode<synchronous>, transform_indices = @transform_4, window_bounds = array<i64: 1024, 5>}, {pipeline_mode = #tpu.pipeline_mode<synchronous>, transform_indices = @transform_5, window_bounds = array<i64: 1, 5>}, {transform_indices = @transform_6, window_bounds = array<i64: 1, 1, 128>}]} {
    %c0 = arith.constant 0 : index
    %c0_0 = arith.constant 0 : index
    %0 = vector.load %arg1[%c0, %c0_0] : memref<16x32xbf16, #tpu.memory_space<vmem>>, vector<16x32xbf16>
    %c0_1 = arith.constant 0 : index
    %c0_2 = arith.constant 0 : index
    %1 = vector.load %arg3[%c0_1, %c0_2] : memref<32x1024xbf16, #tpu.memory_space<vmem>>, vector<32x1024xbf16>
    %cst = arith.constant dense<0.000000e+00> : vector<16x1024xf32>
    %2 = tpu.matmul %0, %1, %cst {dimension_numbers = #tpu.dot_dimension_numbers<[1], [0], [0], [1], [0, 0, 1, 1], [], []>} : vector<16x32xbf16>, vector<32x1024xbf16>, vector<16x1024xf32> -> vector<16x1024xf32>
    %c0_3 = arith.constant 0 : index
    %c0_4 = arith.constant 0 : index
    %3 = vector.load %arg4[%c0_3, %c0_4] : memref<1x1024xf32, #tpu.memory_space<vmem>>, vector<1x1024xf32>
    %4 = vector.broadcast %3 : vector<1x1024xf32> to vector<16x1024xf32>
    %5 = arith.addf %2, %4 : vector<16x1024xf32>
    %cst_5 = arith.constant 0.000000e+00 : f32
    %6 = vector.broadcast %cst_5 : f32 to vector<16x1024xf32>
    %7 = arith.maximumf %5, %6 : vector<16x1024xf32>
    %8 = arith.truncf %7 : vector<16x1024xf32> to vector<16x1024xbf16>
    %c0_6 = arith.constant 0 : index
    %c0_7 = arith.constant 0 : index
    %9 = vector.load %arg5[%c0_6, %c0_7] : memref<1024x5xbf16, #tpu.memory_space<vmem>>, vector<1024x5xbf16>
    %cst_8 = arith.constant dense<0.000000e+00> : vector<16x5xf32>
    %10 = tpu.matmul %8, %9, %cst_8 {dimension_numbers = #tpu.dot_dimension_numbers<[1], [0], [0], [1], [0, 0, 1, 1], [], []>} : vector<16x1024xbf16>, vector<1024x5xbf16>, vector<16x5xf32> -> vector<16x5xf32>
    %c0_9 = arith.constant 0 : index
    %c0_10 = arith.constant 0 : index
    %11 = vector.load %arg6[%c0_9, %c0_10] : memref<1x5xf32, #tpu.memory_space<vmem>>, vector<1x5xf32>
    %12 = vector.broadcast %11 : vector<1x5xf32> to vector<16x5xf32>
    %13 = arith.addf %10, %12 : vector<16x5xf32>
    %14 = vector.extract_strided_slice %13 {offsets = [0, 0], sizes = [16, 4], strides = [1, 1]} : vector<16x5xf32> to vector<16x4xf32>
    %15 = vector.extract_strided_slice %13 {offsets = [0, 4], sizes = [16, 1], strides = [1, 1]} : vector<16x5xf32> to vector<16x1xf32>
    %c0_11 = arith.constant 0 : index
    %c0_12 = arith.constant 0 : index
    %16 = vector.load %arg2[%c0_11, %c0_12] : memref<16x8xf32, #tpu.memory_space<vmem>>, vector<16x8xf32>
    %17 = vector.extract_strided_slice %16 {offsets = [0, 0], sizes = [16, 4], strides = [1, 1]} : vector<16x8xf32> to vector<16x4xf32>
    %18 = vector.extract_strided_slice %16 {offsets = [0, 4], sizes = [16, 1], strides = [1, 1]} : vector<16x8xf32> to vector<16x1xf32>
    %19 = vector.extract_strided_slice %16 {offsets = [0, 5], sizes = [16, 1], strides = [1, 1]} : vector<16x8xf32> to vector<16x1xf32>
    %20 = vector.extract_strided_slice %16 {offsets = [0, 6], sizes = [16, 1], strides = [1, 1]} : vector<16x8xf32> to vector<16x1xf32>
    %21 = vector.extract_strided_slice %16 {offsets = [0, 7], sizes = [16, 1], strides = [1, 1]} : vector<16x8xf32> to vector<16x1xf32>
    %22 = arith.subf %17, %14 : vector<16x4xf32>
    %23 = arith.mulf %22, %22 : vector<16x4xf32>
    %cst_13 = arith.constant dense<0.000000e+00> : vector<16xf32>
    %24 = vector.multi_reduction <add>, %23, %cst_13 [1] : vector<16x4xf32> to vector<16xf32>
    %25 = vector.shape_cast %24 : vector<16xf32> to vector<16x1xf32>
    %cst_14 = arith.constant 2.77777767 : f32
    %26 = vector.broadcast %cst_14 : f32 to vector<16x1xf32>
    %27 = arith.mulf %25, %26 : vector<16x1xf32>
    %cst_15 = arith.constant 3.26490331 : f32
    %28 = vector.broadcast %cst_15 : f32 to vector<16x1xf32>
    %29 = arith.addf %27, %28 : vector<16x1xf32>
    %cst_16 = arith.constant -5.000000e-01 : f32
    %30 = vector.broadcast %cst_16 : f32 to vector<16x1xf32>
    %31 = arith.mulf %30, %29 : vector<16x1xf32>
    %32 = arith.subf %31, %18 : vector<16x1xf32>
    %33 = math.exp %32 : vector<16x1xf32>
    %34 = arith.mulf %33, %20 : vector<16x1xf32>
    %cst_17 = arith.constant 8.000000e-01 : f32
    %cst_18 = arith.constant 1.200000e+00 : f32
    %35 = vector.broadcast %cst_17 : f32 to vector<16x1xf32>
    %36 = arith.maximumf %35, %33 : vector<16x1xf32>
    %37 = vector.broadcast %cst_18 : f32 to vector<16x1xf32>
    %38 = arith.minimumf %37, %36 : vector<16x1xf32>
    %39 = arith.mulf %38, %20 : vector<16x1xf32>
    %40 = arith.minimumf %34, %39 : vector<16x1xf32>
    %cst_19 = arith.constant 0.000000e+00 : f32
    %41 = vector.broadcast %cst_19 : f32 to vector<16x1xf32>
    %42 = arith.subf %41, %40 : vector<16x1xf32>
    %43 = arith.subf %15, %19 : vector<16x1xf32>
    %44 = arith.mulf %43, %43 : vector<16x1xf32>
    %cst_20 = arith.constant 5.000000e-01 : f32
    %45 = vector.broadcast %cst_20 : f32 to vector<16x1xf32>
    %46 = arith.mulf %45, %44 : vector<16x1xf32>
    %47 = arith.addf %42, %46 : vector<16x1xf32>
    %48 = arith.mulf %21, %47 : vector<16x1xf32>
    %49 = vector.shape_cast %48 : vector<16x1xf32> to vector<1x16x1xf32>
    %cst_21 = arith.constant dense<0.000000e+00> : vector<1xf32>
    %50 = vector.multi_reduction <add>, %49, %cst_21 [1, 2] : vector<1x16x1xf32> to vector<1xf32>
    %51 = vector.shape_cast %50 : vector<1xf32> to vector<1x1x1xf32>
    %52 = vector.extract %51[0, 0, 0] : f32 from vector<1x1x1xf32>
    %53 = vector.broadcast %52 : f32 to vector<1x1x128xf32>
    %c0_22 = arith.constant 0 : index
    %c0_23 = arith.constant 0 : index
    %c0_24 = arith.constant 0 : index
    %54 = vector.load %arg7[%c0_22, %c0_23, %c0_24] : memref<1x1x128xf32, #tpu.memory_space<vmem>>, vector<1x1x128xf32>
    tpu.vector_store %arg7[%c0_22, %c0_23, %c0_24], %53 {strides = array<i32>} : memref<1x1x128xf32, #tpu.memory_space<vmem>>, vector<1x1x128xf32>,
    return
  }
  func.func @transform_0(%arg0: i32) -> (i32, i32) {
    %c0_i32 = arith.constant 0 : i32
    %c0_i32_0 = arith.constant 0 : i32
    return %arg0, %c0_i32 : i32, i32
  }
  func.func @transform_1(%arg0: i32) -> (i32, i32) {
    %c0_i32 = arith.constant 0 : i32
    %c0_i32_0 = arith.constant 0 : i32
    return %arg0, %c0_i32 : i32, i32
  }
  func.func @transform_2(%arg0: i32) -> (i32, i32) {
    %c0_i32 = arith.constant 0 : i32
    %c0_i32_0 = arith.constant 0 : i32
    %c0_i32_1 = arith.constant 0 : i32
    return %c0_i32, %c0_i32_0 : i32, i32
  }
  func.func @transform_3(%arg0: i32) -> (i32, i32) {
    %c0_i32 = arith.constant 0 : i32
    %c0_i32_0 = arith.constant 0 : i32
    %c0_i32_1 = arith.constant 0 : i32
    return %c0_i32, %c0_i32_0 : i32, i32
  }
  func.func @transform_4(%arg0: i32) -> (i32, i32) {
    %c0_i32 = arith.constant 0 : i32
    %c0_i32_0 = arith.constant 0 : i32
    %c0_i32_1 = arith.constant 0 : i32
    return %c0_i32, %c0_i32_0 : i32, i32
  }
  func.func @transform_5(%arg0: i32) -> (i32, i32) {
    %c0_i32 = arith.constant 0 : i32
    %c0_i32_0 = arith.constant 0 : i32
    %c0_i32_1 = arith.constant 0 : i32
    return %c0_i32, %c0_i32_0 : i32, i32
  }
  func.func @transform_6(%arg0: i32) -> (i32, i32, i32) {
    %c0_i32 = arith.constant 0 : i32
    %c0_i32_0 = arith.constant 0 : i32
    %c0_i32_1 = arith.constant 0 : i32
    return %arg0, %c0_i32, %c0_i32_0 : i32, i32, i32
  }
}

</mosaic_0001>

<bundles_post_ra>
// kernel: tpu_custom_call.1
= control target key start
LH: loop header
LB: loop body
LE: loop exit
PB: predicated region body
PF: predicated region fallthrough
CT: control target
= control target key end

     0   :  { %11 = vsyncpa [#allocation3], 0  ;;  %s2328_s0 = inlined_call_operand.vmem [shape: bf16[32,32], index: 0, kind: input, shape index: {}]   ;;  %s2329_s1 = inlined_call_operand.vmem [shape: f32[32,8], index: 1, kind: input, shape index: {}]   ;;  %s2330_s2 = inlined_call_operand.vmem [shape: bf16[32,1024], index: 2, kind: input, shape index: {}]   ;;  %s2331_s3 = inlined_call_operand.vmem [shape: f32[1,1024], index: 3, kind: input, shape index: {}]   ;;  %s2332_s4 = inlined_call_operand.vmem [shape: bf16[1024,5], index: 4, kind: input, shape index: {}]   ;;  %s2333_s5 = inlined_call_operand.vmem [shape: f32[1,5], index: 5, kind: input, shape index: {}]   ;;  %s2334_s6 = inlined_call_operand.hbm [shape: f32[2,1,128], index: 6, kind: output, shape index: {}]  }
   0x1   :  { %13 = vsyncpa [#allocation3 + $0x1], 0  ;;  %s1911_s21 = smov 0   ;;  %s1913_s22 = smov 0  }
   0x2   :  { %s1915_s23 = smov 0   ;;  %s1917_s24 = smov 0  }
   0x3 LB: > { %s1932_s25 = sadd.s32 4294967295, %s1870_s24   ;;  %s1335_s26 = sadd.s32 4294967294, %s1870_s24   ;;  %s1870_s24 = sphi %s1917_s24, %s2340_s24   ;;  %s1866_s23 = sphi %s1915_s23, %s2339_s23   ;;  %s1862_s22 = sphi %s1913_s22, %s2338_s22   ;;  %s1858_s21 = sphi %s1911_s21, %s2337_s21  }
   0x4   : > { %s1936_s27 = sadd.s32 1, %s1870_s24   ;;  %s162_s28 = sadd.s32 1, %s1866_s23 }
   0x5   : > { %s159_s29 = ssub.s32 %s1870_s24, %s1936_s27  ;;  %p172_p0 = scmp.ne.s32.totalorder %s1866_s23, %s1862_s22 }
   0x6   : > { %p160_p1 = scmp.eq.s32.totalorder %s159_s29, 0  ;;  %p173_p2 = scmp.eq.s32.totalorder %s1932_s25, 1 }
   0x7   : > { %p178_p3 = scmp.ne.s32.totalorder %s1862_s22, %s1858_s21  ;;  %p179_p4 = scmp.eq.s32.totalorder %s1335_s26, 1 }
   0x8   : > { %s1947_s30 = scalar_select %p160_p1, %s1866_s23, %s162_s28  }
   0x9   : > { %p1949_p5 = por %p173_p2, %p172_p0  ;;  %p1953_p6 = por %p179_p4, %p178_p3 }
   0xa   : > { %p1338_p7 = scmp.ge.s32.totalorder %s1870_s24, 1  ;;  %p227_p8 = scmp.lt.s32.totalorder %s1870_s24, 3 }
   0xc   : > { %p228_p9 = pnand %p1338_p7, %p227_p8 }
   0xd   : > { %s1339_s11 = sshll.u32 (!%p228_p9), %s1932_s25, 1  ;;  %s1873_s14 = smov (!%p228_p9), 126  }
   0xe   : > { %231 = sbr.rel (%p228_p9) target bundleno = 907 (0x38b), region = 44  ;;  %p262_p10 = scmp.lt.s32.totalorder (!%p228_p9), %s1339_s11, 3 }
   0xf   : > { %s1874_s17 = smov (!%p228_p9), 3   ;;  %s1875_s18 = smov (!%p228_p9), 121  }
  0x10   : > { %s259_s19 = sand.u32 (!%p228_p9), 1, %s1862_s22   ;;  %s1264_s28 = scalar_lea.hbm (!%p228_p9), %s2334_s6, %s1932_s25 }
  0x11   : > { %s260_s29 = scalar_lea.vmem (!%p228_p9), [#allocation2], %s259_s19  ;;  %s1268_s10 = sshll.u32 (!%p228_p9), %s1264_s28, 4  ;;  %s1269_s10 = int_to_ptr.hbm [resolvable:$true] %s1268_s10 }
  0x12   : > { %s1266_s9 = sshll.u32 (!%p228_p9), %s260_s29, 4  ;;  %s1828_s25 = scalar_lea.hbm (!%p228_p9), %s2334_s6, 2  ;;  %s1267_s9 = int_to_ptr.vmem [resolvable:$true] %s1266_s9 }
  0x13   : > { %v1381_v0 = vld [vmem:[%s2330_s2 + $0x40] sm:$0xf]  ;;  %v1686_v2 = vld [vmem:[%s2330_s2 + $0x44] sm:$0xf]  ;;  %v1389_v5 = vld [vmem:[%s2330_s2 + $0x48] sm:$0xf] }
  0x14   : > { %v1690_v1 = vld [vmem:[%s2330_s2 + $0x5c] sm:$0xf0]  ;;  %v1383_v4 = vld [vmem:[%s2330_s2 + $0x60] sm:$0xf0]  ;;  %v1691_v6 = vld [vmem:[%s2330_s2 + $0x64] sm:$0xf0] }
  0x15   : > { %v1382_v3 = vor.u32 %v1690_v1, %v1381_v0  ;;  %v1386_v7 = vor.u32 %v1686_v2, %v1383_v4  ;;  %v1390_v8 = vor.u32 %v1691_v6, %v1389_v5  ;;  %v1687_v9 = vld [vmem:[%s2330_s2 + $0x4c] sm:$0xf]  ;;  %v1349_v11 = vld [vmem:[%s2330_s2] sm:$0xf]  ;;  %v1678_v14 = vld [vmem:[%s2330_s2 + $0x4] sm:$0xf] }
  0x16   : > { %v1391_v10 = vld [vmem:[%s2330_s2 + $0x68] sm:$0xf0]  ;;  %v1682_v13 = vld [vmem:[%s2330_s2 + $0x1c] sm:$0xf0]  ;;  %v1351_v15 = vld [vmem:[%s2330_s2 + $0x20] sm:$0xf0] }
  0x17   : > { %405 = vmatpush.bf16.msra.mxu0 %v1382_v3  ;;  %v1394_v12 = vor.u32 %v1687_v9, %v1391_v10  ;;  %419 = vmatpush.bf16.msra.mxu1 %v1386_v7  ;;  %v1350_v16 = vor.u32 %v1682_v13, %v1349_v11  ;;  %v1354_v17 = vor.u32 %v1678_v14, %v1351_v15  ;;  %v1357_v18 = vld [vmem:[%s2330_s2 + $0x8] sm:$0xf]  ;;  %v1679_v20 = vld [vmem:[%s2330_s2 + $0xc] sm:$0xf]  ;;  %v1405_v23 = vld [vmem:[%s2330_s2 + $0x58] sm:$0xf] }
  0x18   : > { %433 = vmatpush.bf16.msra.mxu2 %v1390_v8  ;;  %v1683_v19 = vld [vmem:[%s2330_s2 + $0x24] sm:$0xf0]  ;;  %v1359_v22 = vld [vmem:[%s2330_s2 + $0x28] sm:$0xf0]  ;;  %v1693_v25 = vld [vmem:[%s2330_s2 + $0x74] sm:$0xf0] }
  0x19   : > { %447 = vmatpush.bf16.msra.mxu3 %v1394_v12  ;;  %v1358_v21 = vor.u32 %v1683_v19, %v1357_v18  ;;  %v1362_v24 = vor.u32 %v1679_v20, %v1359_v22  ;;  %v1689_v26 = vld [vmem:[%s2330_s2 + $0x5c] sm:$0xf]  ;;  %v1406_v27 = vor.u32 %v1693_v25, %v1405_v23  ;;  %v1397_v29 = vld [vmem:[%s2330_s2 + $0x50] sm:$0xf]  ;;  %s2342_s11 = smov (!%p262_p10, %s1339_s11), 3  ;;  %vm395_vm0 = vcmask 261120  }
  0x1a   : > { %v1407_v28 = vld [vmem:[%s2330_s2 + $0x78] sm:$0xf0]  ;;  %v1692_v30 = vld [vmem:[%s2330_s2 + $0x6c] sm:$0xf0]  ;;  %v1373_v33 = vld [vmem:[%s2330_s2 + $0x18] sm:$0xf] }
  0x1b   : > { %406 = vmatpush.bf16.msra.mxu0 %v1350_v16  ;;  %420 = vmatpush.bf16.msra.mxu1 %v1354_v17  ;;  %v1410_v31 = vor.u32 %v1689_v26, %v1407_v28  ;;  %v1398_v32 = vor.u32 %v1692_v30, %v1397_v29  ;;  %v1685_v34 = vld [vmem:[%s2330_s2 + $0x34] sm:$0xf0]  ;;  %v1688_v36 = vld [vmem:[%s2330_s2 + $0x54] sm:$0xf]  ;;  %v1681_v38 = vld [vmem:[%s2330_s2 + $0x1c] sm:$0xf] }
  0x1c   : > { %434 = vmatpush.bf16.msra.mxu2 %v1358_v21  ;;  %v1374_v35 = vor.u32 %v1685_v34, %v1373_v33  ;;  %v1399_v37 = vld [vmem:[%s2330_s2 + $0x70] sm:$0xf0]  ;;  %s1340_s20 = sshll.u32 %s2342_s11, 2  ;;  %v1375_v40 = vld [vmem:[%s2330_s2 + $0x38] sm:$0xf0]  ;;  %v1699_v57 = vld [vmem:[%s2332_s4 + $0x28] sm:$0xff] }
  0x1d   : > { %448 = vmatpush.bf16.msra.mxu3 %v1362_v24  ;;  %v1402_v39 = vor.u32 %v1688_v36, %v1399_v37  ;;  %v1365_v41 = vld [vmem:[%s2330_s2 + $0x10] sm:$0xf]  ;;  %s265_s13 = scalar_lea.vmem %s2328_s0, %s1340_s20  ;;  %v1680_v43 = vld [vmem:[%s2330_s2 + $0x14] sm:$0xf]  ;;  %v1378_v46 = vor.u32 %v1681_v38, %v1375_v40  ;;  %v1701_v49 = vld [vmem:[%s2332_s4 + $0x38] sm:$0xff]  ;;  %s1342_s26 = sshll.u32 %s2342_s11, 3 }
  0x1e   : > { %v1684_v42 = vld [vmem:[%s2330_s2 + $0x2c] sm:$0xf0]  ;;  %v1367_v44 = vld [vmem:[%s2330_s2 + $0x30] sm:$0xf0]  ;;  %v1677_v45 = vld [vmem:[%s265_s13] sm:$0xff]  ;;  %s271_s13 = scalar_lea.vmem %s2329_s1, %s1342_s26  ;;  %s1872_s11 = smov 127  }
  0x1f   : > { %461 = vmatpush.bf16.msrb.mxu0 %v1398_v32  ;;  %475 = vmatpush.bf16.msrb.mxu1 %v1402_v39  ;;  %v1366_v47 = vor.u32 %v1684_v42, %v1365_v41  ;;  %v1370_v48 = vor.u32 %v1680_v43, %v1367_v44  ;;  %v1709_v50 = vld [vmem:[%s2332_s4 + $0x78] sm:$0xff]  ;;  %v1700_v53 = vld [vmem:[%s2332_s4 + $0x30] sm:$0xff]  ;;  %v1707_v58 = vld [vmem:[%s2332_s4 + $0x68] sm:$0xff]  ;;  %vm1169_vm1 = vcmask 31744   ;;  %vm1240_vm2 = vcmask 7168  }
  0x20   : > { %489 = vmatpush.bf16.msrb.mxu2 %v1406_v27  ;;  %1411 = vmatmul.msk.bf16.vlgmr.msra.gmra.mxu0 %vm395_vm0, %v1677_v45  ;;  %v1717_v51 = vld [vmem:[%s2332_s4 + $0xb8] sm:$0xff]  ;;  %v1708_v54 = vld [vmem:[%s2332_s4 + $0x70] sm:$0xff]  ;;  %v1715_v59 = vld [vmem:[%s2332_s4 + $0xa8] sm:$0xff] }
  0x21   : > { %503 = vmatpush.bf16.msrb.mxu3 %v1410_v31  ;;  %1412 = vmatmul.msk.bf16.vlgmr.msra.gmra.mxu1 %vm395_vm0, %v1677_v45  ;;  %v1725_v52 = vld [vmem:[%s2332_s4 + $0xf8] sm:$0xff]  ;;  %v1716_v55 = vld [vmem:[%s2332_s4 + $0xb0] sm:$0xff]  ;;  %v1723_v60 = vld [vmem:[%s2332_s4 + $0xe8] sm:$0xff] }
  0x22   : > { %1413 = vmatmul.msk.bf16.vlgmr.msra.gmra.mxu2 %vm395_vm0, %v1677_v45  ;;  %1414 = vmatmul.msk.bf16.vlgmr.msra.gmra.mxu3 %vm395_vm0, %v1677_v45  ;;  %v1724_v56 = vld [vmem:[%s2332_s4 + $0xf0] sm:$0xff]  ;;  %v1698_v61 = vld [vmem:[%s2332_s4 + $0x20] sm:$0xff]  ;;  %v1697_v0 = vld [vmem:[%s2332_s4 + $0x18] sm:$0xff] }
  0x23   : > { %462 = vmatpush.bf16.msrb.mxu0 %v1366_v47  ;;  %476 = vmatpush.bf16.msrb.mxu1 %v1370_v48  ;;  %v1706_v62 = vld [vmem:[%s2332_s4 + $0x60] sm:$0xff]  ;;  %v1705_v2 = vld [vmem:[%s2332_s4 + $0x58] sm:$0xff]  ;;  %v1696_v4 = vld [vmem:[%s2332_s4 + $0x10] sm:$0xff] }
  0x24   : > { %490 = vmatpush.bf16.msrb.mxu2 %v1374_v35  ;;  %v1714_v63 = vld [vmem:[%s2332_s4 + $0xa0] sm:$0xff]  ;;  %v1713_v3 = vld [vmem:[%s2332_s4 + $0x98] sm:$0xff]  ;;  %v1704_v6 = vld [vmem:[%s2332_s4 + $0x50] sm:$0xff] }
  0x25   : > { %504 = vmatpush.bf16.msrb.mxu3 %v1378_v46  ;;  %v1722_v1 = vld [vmem:[%s2332_s4 + $0xe0] sm:$0xff]  ;;  %v1721_v5 = vld [vmem:[%s2332_s4 + $0xd8] sm:$0xff]  ;;  %v1712_v7 = vld [vmem:[%s2332_s4 + $0x90] sm:$0xff] }
  0x26   : > { %v1695_v8 = vld [vmem:[%s2332_s4 + $0x8] sm:$0xff]  ;;  %v1720_v9 = vld [vmem:[%s2332_s4 + $0xd0] sm:$0xff]  ;;  %v1694_v11 = vld [vmem:[%s2332_s4] sm:$0xff] }
  0x27   : > { %1051 = vmatpush.bf16.msra.mxu0 %v1701_v49  ;;  %1065 = vmatpush.bf16.msra.mxu1 %v1709_v50  ;;  %v1703_v10 = vld [vmem:[%s2332_s4 + $0x48] sm:$0xff]  ;;  %v1702_v12 = vld [vmem:[%s2332_s4 + $0x40] sm:$0xff]  ;;  %v1733_v13 = vld [vmem:[%s2332_s4 + $0x138] sm:$0xff] }
  0x28   : > { %1079 = vmatpush.bf16.msra.mxu2 %v1717_v51  ;;  %v1741_v14 = vld [vmem:[%s2332_s4 + $0x178] sm:$0xff]  ;;  %v1711_v15 = vld [vmem:[%s2332_s4 + $0x88] sm:$0xff]  ;;  %v1732_v17 = vld [vmem:[%s2332_s4 + $0x130] sm:$0xff] }
  0x29   : > { %1093 = vmatpush.bf16.msra.mxu3 %v1725_v52  ;;  %v1719_v16 = vld [vmem:[%s2332_s4 + $0xc8] sm:$0xff]  ;;  %v1740_v18 = vld [vmem:[%s2332_s4 + $0x170] sm:$0xff]  ;;  %v1710_v19 = vld [vmem:[%s2332_s4 + $0x80] sm:$0xff] }
  0x2a   : > { %v1718_v20 = vld [vmem:[%s2332_s4 + $0xc0] sm:$0xff]  ;;  %v1749_v21 = vld [vmem:[%s2332_s4 + $0x1b8] sm:$0xff]  ;;  %v1731_v23 = vld [vmem:[%s2332_s4 + $0x128] sm:$0xff] }
  0x2b   : > { %1052 = vmatpush.bf16.msra.mxu0 %v1700_v53  ;;  %1066 = vmatpush.bf16.msra.mxu1 %v1708_v54  ;;  %v1757_v22 = vld [vmem:[%s2332_s4 + $0x1f8] sm:$0xff]  ;;  %v1739_v24 = vld [vmem:[%s2332_s4 + $0x168] sm:$0xff]  ;;  %v1748_v25 = vld [vmem:[%s2332_s4 + $0x1b0] sm:$0xff] }
  0x2c   : > { %1080 = vmatpush.bf16.msra.mxu2 %v1716_v55  ;;  %v1756_v26 = vld [vmem:[%s2332_s4 + $0x1f0] sm:$0xff]  ;;  %v1730_v27 = vld [vmem:[%s2332_s4 + $0x120] sm:$0xff]  ;;  %v1747_v29 = vld [vmem:[%s2332_s4 + $0x1a8] sm:$0xff] }
  0x2d   : > { %1094 = vmatpush.bf16.msra.mxu3 %v1724_v56  ;;  %v1738_v28 = vld [vmem:[%s2332_s4 + $0x160] sm:$0xff]  ;;  %v1755_v30 = vld [vmem:[%s2332_s4 + $0x1e8] sm:$0xff]  ;;  %v1729_v31 = vld [vmem:[%s2332_s4 + $0x118] sm:$0xff] }
  0x2e   : > { %v1737_v32 = vld [vmem:[%s2332_s4 + $0x158] sm:$0xff]  ;;  %v1746_v33 = vld [vmem:[%s2332_s4 + $0x1a0] sm:$0xff]  ;;  %v1728_v35 = vld [vmem:[%s2332_s4 + $0x110] sm:$0xff] }
  0x2f   : > { %1053 = vmatpush.bf16.msra.mxu0 %v1699_v57  ;;  %1067 = vmatpush.bf16.msra.mxu1 %v1707_v58  ;;  %v1754_v34 = vld [vmem:[%s2332_s4 + $0x1e0] sm:$0xff]  ;;  %v1736_v36 = vld [vmem:[%s2332_s4 + $0x150] sm:$0xff]  ;;  %v1745_v37 = vld [vmem:[%s2332_s4 + $0x198] sm:$0xff] }
  0x30   : > { %1081 = vmatpush.bf16.msra.mxu2 %v1715_v59  ;;  %1415 = vmatmul.msk.bf16.vlgmr.msrb.gmra.mxu0 %vm395_vm0, %v1677_v45  ;;  %v1753_v38 = vld [vmem:[%s2332_s4 + $0x1d8] sm:$0xff]  ;;  %v1727_v39 = vld [vmem:[%s2332_s4 + $0x108] sm:$0xff]  ;;  %v1744_v41 = vld [vmem:[%s2332_s4 + $0x190] sm:$0xff] }
  0x31   : > { %1095 = vmatpush.bf16.msra.mxu3 %v1723_v60  ;;  %1416 = vmatmul.msk.bf16.vlgmr.msrb.gmra.mxu1 %vm395_vm0, %v1677_v45  ;;  %v1735_v40 = vld [vmem:[%s2332_s4 + $0x148] sm:$0xff]  ;;  %v1752_v42 = vld [vmem:[%s2332_s4 + $0x1d0] sm:$0xff]  ;;  %v1726_v43 = vld [vmem:[%s2332_s4 + $0x100] sm:$0xff] }
  0x32   : > { %1417 = vmatmul.msk.bf16.vlgmr.msrb.gmra.mxu2 %vm395_vm0, %v1677_v45  ;;  %1418 = vmatmul.msk.bf16.vlgmr.msrb.gmra.mxu3 %vm395_vm0, %v1677_v45  ;;  %v1734_v44 = vld [vmem:[%s2332_s4 + $0x140] sm:$0xff]  ;;  %v1743_v45 = vld [vmem:[%s2332_s4 + $0x188] sm:$0xff] }
  0x33   : > { %1054 = vmatpush.bf16.msra.mxu0 %v1698_v61  ;;  %1068 = vmatpush.bf16.msra.mxu1 %v1706_v62  ;;  %v1751_v46 = vld [vmem:[%s2332_s4 + $0x1c8] sm:$0xff]  ;;  %v2259_v47 = vld [vmem:[%s2331_s3] sm:$0xff] }
  0x34   : > { %1082 = vmatpush.bf16.msra.mxu2 %v1714_v63  ;;  %v294_v50 = vperm.slane %v2259_v47, 0  ;;  %v295_v51 = vperm.slane %v2259_v47, 1  ;;  %v1742_v52 = vld [vmem:[%s2332_s4 + $0x180] sm:$0xff] }
  0x35   : > { %1096 = vmatpush.bf16.msra.mxu3 %v1722_v1  ;;  %v1750_v53 = vld [vmem:[%s2332_s4 + $0x1c0] sm:$0xff]  ;;  %v296_v1 = vperm.slane %v2259_v47, 2 }
  0x36   : > { %v2273_v56 = vld [vmem:[%s271_s13] sm:$0xff] }
  0x37   : > { %1055 = vmatpush.bf16.msra.mxu0 %v1697_v0  ;;  %1069 = vmatpush.bf16.msra.mxu1 %v1705_v2  ;;  %v297_v2 = vperm.slane %v2259_v47, 3 }
  0x38   : > { %1083 = vmatpush.bf16.msra.mxu2 %v1713_v3  ;;  %1208 = vrot.lane.b32.xlu2 %v2273_v56, %s1872_s11 }
  0x39   : > { %1097 = vmatpush.bf16.msra.mxu3 %v1721_v5  ;;  %1190 = vrot.lane.b32.xlu1 %v2273_v56, %s1873_s14 }
  0x3b   : > { %1056 = vmatpush.bf16.msra.mxu0 %v1696_v4  ;;  %1070 = vmatpush.bf16.msra.mxu1 %v1704_v6 }
  0x3c   : > { %1084 = vmatpush.bf16.msra.mxu2 %v1712_v7  ;;  %v2278_v7 = vld [vmem:[%s271_s13 + $0x8] sm:$0xff]  ;;  %s1256_s13 = scalar_lea.sflag [#allocation3], %s259_s19 }
  0x3d   : > { %1098 = vmatpush.bf16.msra.mxu3 %v1720_v9 }
  0x3f   : > { %1057 = vmatpush.bf16.msra.mxu0 %v1695_v8  ;;  %1071 = vmatpush.bf16.msra.mxu1 %v1703_v10 }
  0x40   : > { %1085 = vmatpush.bf16.msra.mxu2 %v1711_v15  ;;  %1210 = vrot.lane.b32.xlu2 %v2278_v7, %s1872_s11  ;;  %s1822_s11 = sshra.s32 %s1269_s10, 4  ;;  %s1823_s11 = int_to_ptr.hbm [resolvable:$true] %s1822_s11 }
  0x41   : > { %1099 = vmatpush.bf16.msra.mxu3 %v1719_v16  ;;  %v298_v16 = vperm.slane %v2259_v47, 4  ;;  %1192 = vrot.lane.b32.xlu1 %v2278_v7, %s1873_s14  ;;  %s1824_s14 = scalar_lea.hbm %s1823_s11, 1  ;;  %p1829_p0 = scmp.lt.s32.totalorder %s1823_s11, %s2334_s6 }
  0x42   : > { %p1825_p11 = scmp.ne.s32.totalorder %s1823_s11, %s1824_s14  ;;  %p1830_p1 = scmp.lt.s32.totalorder %s1828_s25, %s1824_s14 }
  0x43   : > { %1058 = vmatpush.bf16.msra.mxu0 %v1694_v11  ;;  %1072 = vmatpush.bf16.msra.mxu1 %v1702_v12 }
  0x44   : > { %1086 = vmatpush.bf16.msra.mxu2 %v1710_v19  ;;  %p1826_p12 = pnand %p1825_p11, %p1949_p5  ;;  %p1831_p2 = por %p1830_p1, %p1829_p0 }
  0x45   : > { %1100 = vmatpush.bf16.msra.mxu3 %v1718_v20 }
  0x46   : > { %p1827_p13 = pneg %p1826_p12 }
  0x47   : > { %1107 = vmatpush.bf16.msrb.mxu0 %v1733_v13  ;;  %1121 = vmatpush.bf16.msrb.mxu1 %v1741_v14 }
  0x48   : > { %1135 = vmatpush.bf16.msrb.mxu2 %v1749_v21  ;;  %p1832_p3 = pnand %p1831_p2, %p1827_p13 }
  0x49   : > { %1149 = vmatpush.bf16.msrb.mxu3 %v1757_v22 }
  0x4b   : > { %1108 = vmatpush.bf16.msrb.mxu0 %v1732_v17  ;;  %1122 = vmatpush.bf16.msrb.mxu1 %v1740_v18  ;;  %v299_v17 = vperm.slane %v2259_v47, 5 }
  0x4c   : > { %1136 = vmatpush.bf16.msrb.mxu2 %v1748_v25 }
  0x4d   : > { %1150 = vmatpush.bf16.msrb.mxu3 %v1756_v26 }
  0x4f   : > { %1109 = vmatpush.bf16.msrb.mxu0 %v1731_v23  ;;  %1123 = vmatpush.bf16.msrb.mxu1 %v1739_v24 }
  0x50   : > { %1137 = vmatpush.bf16.msrb.mxu2 %v1747_v29 }
  0x51   : > { %1151 = vmatpush.bf16.msrb.mxu3 %v1755_v30 }
  0x53   : > { %1110 = vmatpush.bf16.msrb.mxu0 %v1730_v27  ;;  %1124 = vmatpush.bf16.msrb.mxu1 %v1738_v28 }
  0x54   : > { %1138 = vmatpush.bf16.msrb.mxu2 %v1746_v33 }
  0x55   : > { %1152 = vmatpush.bf16.msrb.mxu3 %v1754_v34  ;;  %v300_v34 = vperm.slane %v2259_v47, 6 }
  0x57   : > { %1111 = vmatpush.bf16.msrb.mxu0 %v1729_v31  ;;  %1125 = vmatpush.bf16.msrb.mxu1 %v1737_v32 }
  0x58   : > { %1139 = vmatpush.bf16.msrb.mxu2 %v1745_v37 }
  0x59   : > { %1153 = vmatpush.bf16.msrb.mxu3 %v1753_v38 }
  0x5b   : > { %1112 = vmatpush.bf16.msrb.mxu0 %v1728_v35  ;;  %1126 = vmatpush.bf16.msrb.mxu1 %v1736_v36  ;;  %v301_v35 = vperm.slane %v2259_v47, 7 }
  0x5c   : > { %1140 = vmatpush.bf16.msrb.mxu2 %v1744_v41 }
  0x5d   : > { %1154 = vmatpush.bf16.msrb.mxu3 %v1752_v42 }
  0x5f   : > { %1113 = vmatpush.bf16.msrb.mxu0 %v1727_v39  ;;  %1127 = vmatpush.bf16.msrb.mxu1 %v1735_v40 }
  0x60   : > { %1141 = vmatpush.bf16.msrb.mxu2 %v1743_v45 }
  0x61   : > { %1155 = vmatpush.bf16.msrb.mxu3 %v1751_v46 }
  0x63   : > { %1114 = vmatpush.bf16.msrb.mxu0 %v1726_v43  ;;  %1128 = vmatpush.bf16.msrb.mxu1 %v1734_v44 }
  0x64   : > { %1142 = vmatpush.bf16.msrb.mxu2 %v1742_v52 }
  0x65   : > { %1156 = vmatpush.bf16.msrb.mxu3 %v1750_v53 }
  0x9d   : > { %v408_v48 = vpop.f32.mrf.mxu0 }
  0x9e   : > { %v422_v49 = vpop.f32.mrf.mxu1  ;;  %v409_v54 = vadd.f32 %v408_v48, %v294_v50 }
  0x9f   : > { %v423_v55 = vadd.f32 %v422_v49, %v295_v51 }
  0xa0   : > { %v511_v61 = vmax.f32 %v409_v54, 0.0  ;;  %v1803_v54 = vld [vmem:[%s2333_s5] ss:$0 sm:$0xff] }
  0xa1   : > { %v512_v62 = vmax.f32 %v423_v55, 0.0 }
  0xa5   : > { %v436_v57 = vpop.f32.mrf.mxu2  ;;  %v450_v58 = vpop.f32.mrf.mxu3 }
  0xa6   : > { %v410_v59 = vpop.f32.mrf.mxu0  ;;  %v424_v60 = vpop.f32.mrf.mxu1  ;;  %v437_v8 = vadd.f32 %v436_v57, %v296_v1  ;;  %v451_v9 = vadd.f32 %v450_v58, %v297_v2 }
  0xa7   : > { %v411_v63 = vadd.f32 %v410_v59, %v294_v50  ;;  %v425_v0 = vadd.f32 %v424_v60, %v295_v51 }
  0xa8   : > { %v513_v18 = vmax.f32 %v437_v8, 0.0  ;;  %v514_v19 = vmax.f32 %v451_v9, 0.0 }
  0xa9   : > { %v519_v3 = vmax.f32 %v411_v63, 0.0  ;;  %v520_v4 = vmax.f32 %v425_v0, 0.0 }
  0xab   : > { %v527_v5 = vpack.c.bf16 %v519_v3, %v511_v61  ;;  %v528_v6 = vpack.c.bf16 %v520_v4, %v512_v62 }
  0xad   : > { %v438_v10 = vpop.f32.mrf.mxu2  ;;  %v452_v11 = vpop.f32.mrf.mxu3  ;;  %1059 = vmatmul.bf16.vlgmr.msra.gmra.mxu0 %v527_v5  ;;  %1073 = vmatmul.bf16.vlgmr.msra.gmra.mxu1 %v528_v6 }
  0xae   : > { %v439_v12 = vadd.f32 %v438_v10, %v296_v1  ;;  %v453_v13 = vadd.f32 %v452_v11, %v297_v2  ;;  %v464_v14 = vpop.f32.mrf.mxu0  ;;  %v478_v15 = vpop.f32.mrf.mxu1 }
  0xaf   : > { %v465_v24 = vadd.f32 %v464_v14, %v298_v16  ;;  %v479_v25 = vadd.f32 %v478_v15, %v299_v17 }
  0xb0   : > { %v521_v20 = vmax.f32 %v439_v12, 0.0  ;;  %v522_v21 = vmax.f32 %v453_v13, 0.0 }
  0xb1   : > { %v515_v30 = vmax.f32 %v465_v24, 0.0  ;;  %v516_v31 = vmax.f32 %v479_v25, 0.0 }
  0xb2   : > { %v529_v22 = vpack.c.bf16 %v521_v20, %v513_v18  ;;  %v530_v23 = vpack.c.bf16 %v522_v21, %v514_v19 }
  0xb4   : > { %1087 = vmatmul.bf16.vlgmr.msra.gmra.mxu2 %v529_v22  ;;  %1101 = vmatmul.bf16.vlgmr.msra.gmra.mxu3 %v530_v23 }
  0xb5   : > { %v492_v26 = vpop.f32.mrf.mxu2  ;;  %v506_v27 = vpop.f32.mrf.mxu3 }
  0xb6   : > { %v466_v28 = vpop.f32.mrf.mxu0  ;;  %v480_v29 = vpop.f32.mrf.mxu1  ;;  %v493_v40 = vadd.f32 %v492_v26, %v300_v34  ;;  %v507_v41 = vadd.f32 %v506_v27, %v301_v35 }
  0xb7   : > { %v467_v32 = vadd.f32 %v466_v28, %v298_v16  ;;  %v481_v33 = vadd.f32 %v480_v29, %v299_v17 }
  0xb8   : > { %v517_v46 = vmax.f32 %v493_v40, 0.0  ;;  %v518_v48 = vmax.f32 %v507_v41, 0.0 }
  0xb9   : > { %v523_v36 = vmax.f32 %v467_v32, 0.0  ;;  %v524_v37 = vmax.f32 %v481_v33, 0.0 }
  0xbb   : > { %v531_v38 = vpack.c.bf16 %v523_v36, %v515_v30  ;;  %v532_v39 = vpack.c.bf16 %v524_v37, %v516_v31 }
  0xbd   : > { %v494_v42 = vpop.f32.mrf.mxu2  ;;  %v508_v43 = vpop.f32.mrf.mxu3  ;;  %1115 = vmatmul.bf16.vlgmr.msrb.gmra.mxu0 %v531_v38  ;;  %1129 = vmatmul.bf16.vlgmr.msrb.gmra.mxu1 %v532_v39 }
  0xbe   : > { %v495_v44 = vadd.f32 %v494_v42, %v300_v34  ;;  %v509_v45 = vadd.f32 %v508_v43, %v301_v35  ;;  %v1209_v38 = vpop.permute.xlu2 %1208  ;;  %v1191_v43 = vpop.permute.xlu1 %1190 }
  0xc0   : > { %v525_v49 = vmax.f32 %v495_v44, 0.0  ;;  %v526_v50 = vmax.f32 %v509_v45, 0.0 }
  0xc2   : > { %v533_v51 = vpack.c.bf16 %v525_v49, %v517_v46  ;;  %v534_v52 = vpack.c.bf16 %v526_v50, %v518_v48 }
  0xc4   : > { %1143 = vmatmul.bf16.vlgmr.msrb.gmra.mxu2 %v533_v51  ;;  %1157 = vmatmul.bf16.vlgmr.msrb.gmra.mxu3 %v534_v52 }
  0xc6   : > { %v1211_v51 = vpop.permute.xlu2 %1210 }
 0x12a   : > { %v1060_v47 = vpop.f32.mrf.mxu0  ;;  %v1074_v53 = vpop.f32.mrf.mxu1 }
 0x12b   : > { %v1061_v57 = vadd.f32 %v1803_v54, %v1060_v47 }
 0x12d   : > { %v1075_v60 = vadd.f32 %v1074_v53, %v1061_v57 }
 0x132   : > { %v1062_v55 = vpop.f32.mrf.mxu0  ;;  %v1076_v61 = vpop.f32.mrf.mxu1 }
 0x133   : > { %v1063_v63 = vadd.f32 %v1803_v54, %v1062_v55 }
 0x135   : > { %v1077_v4 = vadd.f32 %v1076_v61, %v1063_v63 }
 0x137   : > { %v1088_v58 = vpop.f32.mrf.mxu2  ;;  %v1102_v59 = vpop.f32.mrf.mxu3 }
 0x138   : > { %v1089_v62 = vadd.f32 %v1088_v58, %v1075_v60  ;;  %v1193_v58 = vpop.permute.xlu1 %1192 }
 0x13a   : > { %v1116_v0 = vpop.f32.mrf.mxu0  ;;  %v1103_v1 = vadd.f32 %v1102_v59, %v1089_v62  ;;  %v1130_v8 = vpop.f32.mrf.mxu1 }
 0x13c   : > { %v1117_v5 = vadd.f32 %v1116_v0, %v1103_v1 }
 0x13e   : > { %v1131_v9 = vadd.f32 %v1130_v8, %v1117_v5 }
 0x13f   : > { %v1090_v2 = vpop.f32.mrf.mxu2  ;;  %v1104_v3 = vpop.f32.mrf.mxu3 }
 0x140   : > { %v1091_v6 = vadd.f32 %v1090_v2, %v1077_v4 }
 0x142   : > { %v1105_v10 = vadd.f32 %v1104_v3, %v1091_v6  ;;  %v1118_v11 = vpop.f32.mrf.mxu0  ;;  %v1132_v18 = vpop.f32.mrf.mxu1 }
 0x144   : > { %v1119_v15 = vadd.f32 %v1118_v11, %v1105_v10 }
 0x146   : > { %v1133_v19 = vadd.f32 %v1132_v18, %v1119_v15 }
 0x147   : > { %v1144_v12 = vpop.f32.mrf.mxu2  ;;  %v1158_v13 = vpop.f32.mrf.mxu3 }
 0x148   : > { %v1145_v14 = vadd.f32 %v1144_v12, %v1131_v9 }
 0x14a   : > { %v1159_v16 = vadd.f32 %v1158_v13, %v1145_v14 }
 0x14c   : > { %v1165_v17 = vsub.f32 %v2273_v56, %v1159_v16  ;;  %v1214_v44 = vsub.f32 %v1159_v16, %v1209_v38 }
 0x14e   : > { %v1167_v20 = vmul.f32 %v1165_v17, %v1165_v17  ;;  %v1216_v48 = vmul.f32 %v1214_v44, %v1214_v44 }
 0x14f   : > { %v1146_v21 = vpop.f32.mrf.mxu2  ;;  %v1160_v24 = vpop.f32.mrf.mxu3 }
 0x150   : > { %v1147_v22 = vadd.f32 %v1146_v21, %v1133_v19  ;;  %v1170_v23 = vsel %vm1169_vm1, %v1167_v20, 0.0  ;;  %v1218_v53 = vmul.f32 0.5, %v1216_v48 }
 0x151   : > { %1171 = vadd.xlane.f32.xlu0 %v1170_v23 }
 0x152   : > { %v1161_v25 = vadd.f32 %v1160_v24, %v1147_v22 }
 0x154   : > { %v1166_v26 = vsub.f32 %v2278_v7, %v1161_v25  ;;  %v1215_v54 = vsub.f32 %v1161_v25, %v1211_v51 }
 0x156   : > { %v1168_v27 = vmul.f32 %v1166_v26, %v1166_v26  ;;  %v1217_v61 = vmul.f32 %v1215_v54, %v1215_v54 }
 0x158   : > { %v1173_v28 = vsel %vm1169_vm1, %v1168_v27, 0.0  ;;  %v1219_v1 = vmul.f32 0.5, %v1217_v61 }
 0x159   : > { %1174 = vadd.xlane.f32.xlu0 %v1173_v28 }
 0x1c4   : > { %v1172_v29 = vpop.xlane.xlu0 %1171 }
 0x1c5   : > { %v1176_v30 = vmul.f32 2.7777777, %v1172_v29 }
 0x1c7   : > { %v1178_v31 = vadd.f32 3.2649033, %v1176_v30 }
 0x1c9   : > { %v1180_v32 = vmul.f32 -0.5, %v1178_v31 }
 0x1cb   : > { %v1182_v33 = vsub.f32 %v1180_v32, %v2273_v56 }
 0x1cc   : > { %v1175_v34 = vpop.xlane.xlu0 %1174 }
 0x1cd   : > { %v1184_v35 = vmul.f32 1.442695, %v1182_v33  ;;  %v1177_v36 = vmul.f32 2.7777777, %v1175_v34 }
 0x1cf   : > { %1804 = vpow2.f32 %v1184_v35  ;;  %v1179_v37 = vadd.f32 3.2649033, %v1177_v36 }
 0x1d1   : > { %v1181_v39 = vmul.f32 -0.5, %v1179_v37 }
 0x1d3   : > { %v1183_v40 = vsub.f32 %v1181_v39, %v2278_v7 }
 0x1d5   : > { %v1805_v41 = vpop.eup %1804  ;;  %v1186_v42 = vmul.f32 1.442695, %v1183_v40 }
 0x1d6   : > { %v1198_v45 = vmax.f32 %v1805_v41, 0.8  ;;  %v1196_v49 = vmul.f32 %v1805_v41, %v1191_v43 }
 0x1d7   : > { %1806 = vpow2.f32 %v1186_v42 }
 0x1d8   : > { %v1200_v46 = vmin.f32 %v1198_v45, 1.2 }
 0x1da   : > { %v1202_v50 = vmul.f32 %v1200_v46, %v1191_v43 }
 0x1dc   : > { %v1204_v52 = vmin.f32 %v1196_v49, %v1202_v50 }
 0x1dd   : > { %v1807_v47 = vpop.eup %1806 }
 0x1de   : > { %v1206_v55 = vsub.f32 0.0, %v1204_v52  ;;  %v1199_v57 = vmax.f32 %v1807_v47, 0.8  ;;  %v1197_v62 = vmul.f32 %v1807_v47, %v1193_v58 }
 0x1e0   : > { %v1201_v59 = vmin.f32 %v1199_v57, 1.2  ;;  %v1220_v60 = vadd.f32 %v1218_v53, %v1206_v55 }
 0x1e2   : > { %v1203_v63 = vmul.f32 %v1201_v59, %v1193_v58  ;;  %1224 = vrot.lane.b32.xlu0 %v1220_v60, %s1874_s17 }
 0x1e4   : > { %v1205_v0 = vmin.f32 %v1197_v62, %v1203_v63 }
 0x1e6   : > { %v1207_v2 = vsub.f32 0.0, %v1205_v0 }
 0x1e8   : > { %v1221_v3 = vadd.f32 %v1219_v1, %v1207_v2 }
 0x1ea   : > { %1226 = vrot.lane.b32.xlu1 %v1221_v3, %s1874_s17 }
 0x254   : > { %v1225_v4 = vpop.permute.xlu0 %1224 }
 0x255   : > { %v1230_v5 = vmul.f32 %v1225_v4, %v2273_v56 }
 0x257   : > { %1234 = vrot.lane.b32.xlu2 %v1230_v5, %s1875_s18 }
 0x25c   : > { %v1227_v6 = vpop.permute.xlu1 %1226 }
 0x25d   : > { %v1231_v8 = vmul.f32 %v1227_v6, %v2278_v7 }
 0x25f   : > { %1236 = vrot.lane.b32.xlu1 %v1231_v8, %s1875_s18 }
 0x2b1   : > { %v1235_v9 = vpop.permute.xlu2 %1234 }
 0x2b2   : > { %v1241_v11 = vsel %vm1240_vm2, %v1235_v9, 0.0 }
 0x2d1   : > { %v1237_v10 = vpop.permute.xlu1 %1236 }
 0x2d2   : > { %v1242_v12 = vsel %vm1240_vm2, %v1237_v10, 0.0 }
 0x2d3   : > { %v1243_v13 = vadd.f32 %v1242_v12, %v1241_v11 }
 0x2d5   : > { %1244 = vadd.xlane.f32.xlu2 %v1243_v13 }
 0x348   : > { %v1245_v14 = vpop.xlane.xlu2 %1244 }
 0x349   : > { %v1246_v15 = vrot.slane %v1245_v14, 4 }
 0x34b   : > { %v1247_v16 = vadd.f32 %v1246_v15, %v1245_v14 }
 0x34d   : > { %v1248_v17 = vrot.slane %v1247_v16, 2 }
 0x34f   : > { %v1249_v56 = vadd.f32 %v1248_v17, %v1247_v16 }
 0x351   : > { %v1250_v18 = vrot.slane %v1249_v56, 1 }
 0x353   : > { %v1251_v19 = vadd.f32 %v1250_v18, %v1249_v56 }
 0x355   : > { %1758 = vpush %v1251_v19 }
 0x386   : > { %s1759_s12 = spop %1758 }
 0x387   : > { %v1253_v7 = vstv %s1759_s12 }
 0x388   : > { %1254 = vst [vmem:[%s260_s29] sm:$0x1] %v1253_v7 }
 0x389   : > { %1835 = shalt.err (!%p1832_p3)
}
 0x38a   : > { %1760 = dma.vmem_to_hbm [thread:$0]  (%p1949_p5), %s1267_s9, 16, %s1269_s10, %s1256_s13  }
 0x38b PF: > { %p1766_p4 = scmp.ge.s32.totalorder %s1870_s24, 2  ;;  %s1280_s19 = sand.u32 1, %s1858_s21  }
 0x38c   : > { %s1281_s26 = scalar_lea.sflag [#allocation3], %s1280_s19 }
 0x38d   : > { %p1763_p7 = pnand %p1766_p4, %p1953_p6 }
 0x38f   : > { %p1764_p8 = pneg %p1763_p7 }
 0x391   : > { %1853 = dma.done.wait (%p1764_p8), %s1281_s26, 16  }
 0x392   : > { %1855 = vsyncadd (%p1764_p8), %s1281_s26, 4294967280  ;;  %p16_p9 = scmp.ge.s32.totalorder %s1936_s27, 4   ;;  %s2337_s21 = smov %s1862_s22 }
 0x393   : > { %s2338_s22 = smov %s1866_s23  ;;  %s2339_s23 = smov %s1947_s30 }
 0x394   : > { %s2340_s24 = smov %s1936_s27  ;;  %18 = sbr.rel (!%p16_p9) target bundleno = 3 (0x3), region = 82 }
 0x399   :  { %1286 = vsyncpa [#allocation3], 1 }
 0x39a   :  { %1288 = vsyncpa [#allocation3 + $0x1], 1 }

</bundles_post_ra>
